<compile_context>
chip_gen: v6e
topology: v6e:2x2x1
jax: 0.10.0
libtpu: 0.0.40
codegen_flags: <defaults>
</compile_context>

<pallas_src>
import jax
import jax.numpy as jnp
from jax.experimental import pallas as pl
from jax.experimental.pallas import tpu as pltpu

HIDDEN = 32
NHEADS = 8
HEAD_DIM = HIDDEN // NHEADS
FFN_DIM = HIDDEN * 4
LN_EPS = 1e-5

# bf16 MXU feeds (f32 accumulation).  Set to jnp.float32 for bit-closer f32 parity.
MXU_DTYPE = jnp.bfloat16


def _layernorm(x, gamma, beta):
    mu = jnp.mean(x, axis=-1, keepdims=True)
    var = jnp.mean((x - mu) ** 2, axis=-1, keepdims=True)
    return (x - mu) * jax.lax.rsqrt(var + LN_EPS) * gamma + beta


def cross_attn_kernel(q_in_ref, kv_in_ref, wslab_ref, mslab_ref, vec_ref, o_ref):
    B, Lq, E = q_in_ref.shape
    _, Lkv, _ = kv_in_ref.shape
    nq, nk = B * Lq, B * Lkv
    H = NHEADS
    f32 = jnp.float32
    mm = MXU_DTYPE

    # ---- unpack packed parameter slabs (static, sublane-aligned slices) ----
    # wslab (bf16, 32 lanes): [Wq*scale | Wk | Wv | Wo | W2 | vmask], (in, out) layout.
    wq = wslab_ref[0:E, :]
    wk = wslab_ref[E:2 * E, :]
    wv = wslab_ref[2 * E:3 * E, :]
    wo = wslab_ref[3 * E:4 * E, :]
    w2 = wslab_ref[4 * E:4 * E + FFN_DIM, :]
    vmask = wslab_ref[4 * E + FFN_DIM:4 * E + FFN_DIM + H * nk, :]   # (H*nk, E) 0/1

    # mslab (bf16, 128 lanes): [W1 | kmask | tsel | bmask | b1].
    w1 = mslab_ref[0:E, :]                                   # (E, 4E)
    kmask = mslab_ref[E:2 * E, :]                            # (E, H*nk) 0/1 head mask
    tsel = mslab_ref[2 * E:2 * E + nk, :]                    # (nk, H*nk) = [I|I|...|I]
    bmask = mslab_ref[2 * E + nk:2 * E + nk + nq, :]         # (nq, H*nk) 0 / -1e30
    b1 = mslab_ref[2 * E + nk + nq:2 * E + nk + nq + 1, :]   # (1, 4E)

    # vec (f32, 32 lanes): biases + LayerNorm params.
    bq, bk, bv, bo = vec_ref[0:1, :], vec_ref[1:2, :], vec_ref[2:3, :], vec_ref[3:4, :]
    g1, be1 = vec_ref[4:5, :], vec_ref[5:6, :]
    g2, be2 = vec_ref[6:7, :], vec_ref[7:8, :]
    b2 = vec_ref[8:9, :]

    # Flatten batch into rows (layout-trivial: lane dim unchanged).
    xf = q_in_ref[...].reshape(nq, E)           # (16, 32) f32
    kvf = kv_in_ref[...].reshape(nk, E)         # (16, 32) f32

    # ---- Q/K/V projections (bf16 MXU feeds, f32 accumulation, f32 bias adds) ----
    xm = xf.astype(mm)
    kvm = kvf.astype(mm)
    q = jnp.dot(xm, wq, preferred_element_type=f32) + bq    # 1/sqrt(D) already folded in
    k = jnp.dot(kvm, wk, preferred_element_type=f32) + bk
    v = jnp.dot(kvm, wv, preferred_element_type=f32) + bv

    # ---- lane-dense scores: (nq, H*nk) = (16, 128), 2 dense f32 vregs ----
    # km[e, h*nk + j] = k[j, e] * (e//D == h): K is fed pre-transposed and lane-tiled
    # by a tiny MXU selector matmul (XLU stays free; no hidden rhs transpose).
    k_t = k.T.astype(mm)                                                       # (E, nk)
    km = jnp.dot(k_t, tsel, preferred_element_type=f32).astype(mm) * kmask     # (E, H*nk)
    s = jnp.dot(q.astype(mm), km, preferred_element_type=f32)                  # (nq, H*nk)
    s = s + bmask.astype(f32)     # block-diagonal batch mask, applied in f32

    # Softmax over keys.  The row-global max is constant per row, hence a valid
    # per-head stabilizer; masked columns become exactly 0 after exp.
    p = jnp.exp(s - jnp.max(s, axis=-1, keepdims=True))

    # ---- head merge + per-head denominators on the MXU (f32 accumulation) ----
    p_b = p.astype(mm)
    v_stack = jnp.tile(v, (H, 1)).astype(mm) * vmask          # (H*nk, E) head-masked V
    ctx = jnp.dot(p_b, v_stack, preferred_element_type=f32)   # (nq, E) unnormalized
    den = jnp.dot(p_b, vmask, preferred_element_type=f32)     # (nq, E) per-head denom
    attn = ctx * pl.reciprocal(den, approx=True)
    attn = jnp.dot(attn.astype(mm), wo, preferred_element_type=f32) + bo

    # ---- residual + LayerNorm 1 ----
    y1 = _layernorm(xf + attn, g1, be1)

    # ---- FFN: Linear -> ReLU -> Linear (dropouts are identity) ----
    h1 = jnp.dot(y1.astype(mm), w1, preferred_element_type=f32) + b1.astype(f32)
    h1 = jnp.maximum(h1, 0.0)
    ffn = jnp.dot(h1.astype(mm), w2, preferred_element_type=f32) + b2

    # ---- residual + LayerNorm 2 ----
    o_ref[...] = _layernorm(y1 + ffn, g2, be2).reshape(B, Lq, E)


def cross_attention_block(query, key_value, params):
    """query: (B, Lq, E), key_value: (B, Lkv, E) -> (B, Lq, E)."""
    B, Lq, E = query.shape
    _, Lkv, _ = key_value.shape
    assert E == HIDDEN
    H, D = NHEADS, HEAD_DIM
    nq, nk = B * Lq, B * Lkv
    mm = MXU_DTYPE
    f32 = jnp.float32
    scale = 1.0 / (D ** 0.5)

    # --- wrapper-side packing (free XLA ops, outside the kernel) ---
    # PyTorch nn.Linear / MultiheadAttention store (out, in) and compute x @ W.T;
    # pre-transpose to (in, out), pre-cast MXU weights to bf16, fold the attention
    # scale into W_q / b_q, and precompute all static masks.
    w_in = params["in_proj_weight"].reshape(3, E, E)
    wq = w_in[0].T * scale
    wk = w_in[1].T
    wv = w_in[2].T
    wo = params["out_proj_weight"].T
    w2 = params["ffn2_weight"].T                        # (4E, E)
    w1 = params["ffn1_weight"].T                        # (E, 4E)
    b1 = params["ffn1_bias"].reshape(1, FFN_DIM)

    # Score column convention: c = h*nk + j  <->  (head h, key row j).
    col = jnp.arange(H * nk)
    col_h, col_j = col // nk, col % nk
    e_h = jnp.arange(E) // D                                      # head owning lane e
    kmask = (e_h[:, None] == col_h[None, :]).astype(f32)          # (E, H*nk)
    vmask = (col_h[:, None] == e_h[None, :]).astype(f32)          # (H*nk, E)
    tsel = jnp.tile(jnp.eye(nk, dtype=f32), (1, H))               # (nk, H*nk) lane tiler
    bmask = jnp.where((jnp.arange(nq) // Lq)[:, None] == (col_j // Lkv)[None, :],
                      0.0, -1e30)                                 # (nq, H*nk) batch mask

    def pad8(x):
        r = (-x.shape[0]) % 8
        if r == 0:
            return x
        return jnp.concatenate([x, jnp.zeros((r, x.shape[1]), x.dtype)], axis=0)

    wslab = jnp.concatenate([wq, wk, wv, wo, w2, vmask], axis=0).astype(mm)          # (384, 32)
    mslab = pad8(jnp.concatenate([w1, kmask, tsel, bmask, b1], axis=0)).astype(mm)   # (104, 128)
    vec = pad8(jnp.stack([                                                            # (16, 32) f32
        params["in_proj_bias"][0:E] * scale,
        params["in_proj_bias"][E:2 * E],
        params["in_proj_bias"][2 * E:3 * E],
        params["out_proj_bias"],
        params["ln1_weight"], params["ln1_bias"],
        params["ln2_weight"], params["ln2_bias"],
        params["ffn2_bias"],
    ], axis=0))

    vmem = pl.BlockSpec(memory_space=pltpu.MemorySpace.VMEM)
    return pl.pallas_call(
        cross_attn_kernel,
        out_shape=jax.ShapeDtypeStruct((B, Lq, E), jnp.float32),
        in_specs=[vmem] * 5,
        out_specs=vmem,
    )(query, key_value, wslab, mslab, vec)


def init_params(key):
    """Deterministic synthetic parameters, PyTorch-convention shapes."""
    ks = jax.random.split(key, 4)
    s = 0.1
    return {
        "in_proj_weight": s * jax.random.normal(ks[0], (3 * HIDDEN, HIDDEN), jnp.float32),
        "in_proj_bias": jnp.zeros((3 * HIDDEN,), jnp.float32),
        "out_proj_weight": s * jax.random.normal(ks[1], (HIDDEN, HIDDEN), jnp.float32),
        "out_proj_bias": 0.01 * jnp.ones((HIDDEN,), jnp.float32),
        "ln1_weight": jnp.ones((HIDDEN,), jnp.float32),
        "ln1_bias": jnp.zeros((HIDDEN,), jnp.float32),
        "ln2_weight": jnp.ones((HIDDEN,), jnp.float32),
        "ln2_bias": jnp.zeros((HIDDEN,), jnp.float32),
        "ffn1_weight": s * jax.random.normal(ks[2], (FFN_DIM, HIDDEN), jnp.float32),
        "ffn1_bias": 0.01 * jnp.ones((FFN_DIM,), jnp.float32),
        "ffn2_weight": s * jax.random.normal(ks[3], (HIDDEN, FFN_DIM), jnp.float32),
        "ffn2_bias": 0.01 * jnp.ones((HIDDEN,), jnp.float32),
    }


def reference_forward(query, key_value, params):
    """Pure-JAX f32 reference (matches the PyTorch module, eval mode)."""
    B, Lq, E = query.shape
    H, D = NHEADS, HEAD_DIM
    wq, wk, wv = (params["in_proj_weight"][i * E:(i + 1) * E] for i in range(3))
    bq, bk, bv = (params["in_proj_bias"][i * E:(i + 1) * E] for i in range(3))
    q = query @ wq.T + bq
    k = key_value @ wk.T + bk
    v = key_value @ wv.T + bv
    qh = q.reshape(B, Lq, H, D).transpose(0, 2, 1, 3)
    kh = k.reshape(B, -1, H, D).transpose(0, 2, 1, 3)
    vh = v.reshape(B, -1, H, D).transpose(0, 2, 1, 3)
    sc = jnp.einsum('bhqd,bhkd->bhqk', qh, kh) / (D ** 0.5)
    p = jax.nn.softmax(sc, axis=-1)
    ctx = jnp.einsum('bhqk,bhkd->bhqd', p, vh).transpose(0, 2, 1, 3).reshape(B, Lq, E)
    attn = ctx @ params["out_proj_weight"].T + params["out_proj_bias"]

    def ln(x, g, b):
        mu = x.mean(-1, keepdims=True)
        var = ((x - mu) ** 2).mean(-1, keepdims=True)
        return (x - mu) / jnp.sqrt(var + LN_EPS) * g + b

    y1 = ln(query + attn, params["ln1_weight"], params["ln1_bias"])
    h1 = jnp.maximum(y1 @ params["ffn1_weight"].T + params["ffn1_bias"], 0.0)
    ffn = h1 @ params["ffn2_weight"].T + params["ffn2_bias"]
    return ln(y1 + ffn, params["ln2_weight"], params["ln2_bias"])


if __name__ == "__main__":
    key = jax.random.PRNGKey(0)
    k_q, k_kv, k_p = jax.random.split(key, 3)

    B, Lq, Lkv = 2, 8, 8
    query = jax.random.normal(k_q, (B, Lq, HIDDEN), jnp.float32)
    key_value = jax.random.normal(k_kv, (B, Lkv, HIDDEN), jnp.float32)
    params = init_params(k_p)

    out = jax.jit(cross_attention_block)(query, key_value, params)
    jax.block_until_ready(out)
    assert out.shape == (B, Lq, HIDDEN)

    ref = reference_forward(query, key_value, params)
    max_err = float(jnp.max(jnp.abs(out - ref)))
    # bf16 weights/MXU feeds + approx reciprocal -> loose but meaningful tolerance.
    assert max_err < 5e-2, f"kernel/reference mismatch: max_err={max_err}"

    print("KERNEL_OK")
</pallas_src>

<mosaic_0001>
module attributes {stable_mosaic.version = 11 : i64} {
  func.func @cross_attn_kernel(%arg0: memref<2x8x32xf32, #tpu.memory_space<vmem>>, %arg1: memref<2x8x32xf32, #tpu.memory_space<vmem>>, %arg2: memref<384x32xbf16, #tpu.memory_space<vmem>>, %arg3: memref<104x128xbf16, #tpu.memory_space<vmem>>, %arg4: memref<16x32xf32, #tpu.memory_space<vmem>>, %arg5: memref<2x8x32xf32, #tpu.memory_space<vmem>>) attributes {dimension_semantics = [], scalar_prefetch = 0 : i64, scratch_operands = 0 : i64, tpu.core_type = #tpu.core_type<tc>} {
    %c0 = arith.constant 0 : index
    %c0_0 = arith.constant 0 : index
    %0 = vector.load %arg2[%c0, %c0_0] : memref<384x32xbf16, #tpu.memory_space<vmem>>, vector<32x32xbf16>
    %c32 = arith.constant 32 : index
    %c0_1 = arith.constant 0 : index
    %1 = vector.load %arg2[%c32, %c0_1] : memref<384x32xbf16, #tpu.memory_space<vmem>>, vector<32x32xbf16>
    %c64 = arith.constant 64 : index
    %c0_2 = arith.constant 0 : index
    %2 = vector.load %arg2[%c64, %c0_2] : memref<384x32xbf16, #tpu.memory_space<vmem>>, vector<32x32xbf16>
    %c96 = arith.constant 96 : index
    %c0_3 = arith.constant 0 : index
    %3 = vector.load %arg2[%c96, %c0_3] : memref<384x32xbf16, #tpu.memory_space<vmem>>, vector<32x32xbf16>
    %c128 = arith.constant 128 : index
    %c0_4 = arith.constant 0 : index
    %4 = vector.load %arg2[%c128, %c0_4] : memref<384x32xbf16, #tpu.memory_space<vmem>>, vector<128x32xbf16>
    %c256 = arith.constant 256 : index
    %c0_5 = arith.constant 0 : index
    %5 = vector.load %arg2[%c256, %c0_5] : memref<384x32xbf16, #tpu.memory_space<vmem>>, vector<128x32xbf16>
    %c0_6 = arith.constant 0 : index
    %c0_7 = arith.constant 0 : index
    %6 = vector.load %arg3[%c0_6, %c0_7] : memref<104x128xbf16, #tpu.memory_space<vmem>>, vector<32x128xbf16>
    %c32_8 = arith.constant 32 : index
    %c0_9 = arith.constant 0 : index
    %7 = vector.load %arg3[%c32_8, %c0_9] : memref<104x128xbf16, #tpu.memory_space<vmem>>, vector<32x128xbf16>
    %c64_10 = arith.constant 64 : index
    %c0_11 = arith.constant 0 : index
    %8 = vector.load %arg3[%c64_10, %c0_11] : memref<104x128xbf16, #tpu.memory_space<vmem>>, vector<16x128xbf16>
    %c80 = arith.constant 80 : index
    %c0_12 = arith.constant 0 : index
    %9 = vector.load %arg3[%c80, %c0_12] : memref<104x128xbf16, #tpu.memory_space<vmem>>, vector<16x128xbf16>
    %c96_13 = arith.constant 96 : index
    %c0_14 = arith.constant 0 : index
    %10 = vector.load %arg3[%c96_13, %c0_14] : memref<104x128xbf16, #tpu.memory_space<vmem>>, vector<1x128xbf16>
    %c0_15 = arith.constant 0 : index
    %c0_16 = arith.constant 0 : index
    %11 = vector.load %arg4[%c0_15, %c0_16] : memref<16x32xf32, #tpu.memory_space<vmem>>, vector<1x32xf32>
    %c1 = arith.constant 1 : index
    %c0_17 = arith.constant 0 : index
    %12 = vector.load %arg4[%c1, %c0_17] : memref<16x32xf32, #tpu.memory_space<vmem>>, vector<1x32xf32>
    %c2 = arith.constant 2 : index
    %c0_18 = arith.constant 0 : index
    %13 = vector.load %arg4[%c2, %c0_18] : memref<16x32xf32, #tpu.memory_space<vmem>>, vector<1x32xf32>
    %c3 = arith.constant 3 : index
    %c0_19 = arith.constant 0 : index
    %14 = vector.load %arg4[%c3, %c0_19] : memref<16x32xf32, #tpu.memory_space<vmem>>, vector<1x32xf32>
    %c4 = arith.constant 4 : index
    %c0_20 = arith.constant 0 : index
    %15 = vector.load %arg4[%c4, %c0_20] : memref<16x32xf32, #tpu.memory_space<vmem>>, vector<1x32xf32>
    %c5 = arith.constant 5 : index
    %c0_21 = arith.constant 0 : index
    %16 = vector.load %arg4[%c5, %c0_21] : memref<16x32xf32, #tpu.memory_space<vmem>>, vector<1x32xf32>
    %c6 = arith.constant 6 : index
    %c0_22 = arith.constant 0 : index
    %17 = vector.load %arg4[%c6, %c0_22] : memref<16x32xf32, #tpu.memory_space<vmem>>, vector<1x32xf32>
    %c7 = arith.constant 7 : index
    %c0_23 = arith.constant 0 : index
    %18 = vector.load %arg4[%c7, %c0_23] : memref<16x32xf32, #tpu.memory_space<vmem>>, vector<1x32xf32>
    %c8 = arith.constant 8 : index
    %c0_24 = arith.constant 0 : index
    %19 = vector.load %arg4[%c8, %c0_24] : memref<16x32xf32, #tpu.memory_space<vmem>>, vector<1x32xf32>
    %c0_25 = arith.constant 0 : index
    %c0_26 = arith.constant 0 : index
    %c0_27 = arith.constant 0 : index
    %20 = vector.load %arg0[%c0_25, %c0_26, %c0_27] : memref<2x8x32xf32, #tpu.memory_space<vmem>>, vector<2x8x32xf32>
    %21 = vector.shape_cast %20 : vector<2x8x32xf32> to vector<16x32xf32>
    %c0_28 = arith.constant 0 : index
    %c0_29 = arith.constant 0 : index
    %c0_30 = arith.constant 0 : index
    %22 = vector.load %arg1[%c0_28, %c0_29, %c0_30] : memref<2x8x32xf32, #tpu.memory_space<vmem>>, vector<2x8x32xf32>
    %23 = vector.shape_cast %22 : vector<2x8x32xf32> to vector<16x32xf32>
    %24 = arith.truncf %21 : vector<16x32xf32> to vector<16x32xbf16>
    %25 = arith.truncf %23 : vector<16x32xf32> to vector<16x32xbf16>
    %cst = arith.constant dense<0.000000e+00> : vector<16x32xf32>
    %26 = tpu.matmul %24, %0, %cst {dimension_numbers = #tpu.dot_dimension_numbers<[1], [0], [0], [1], [0, 0, 1, 1], [], []>} : vector<16x32xbf16>, vector<32x32xbf16>, vector<16x32xf32> -> vector<16x32xf32>
    %27 = vector.broadcast %11 : vector<1x32xf32> to vector<16x32xf32>
    %28 = arith.addf %26, %27 : vector<16x32xf32>
    %cst_31 = arith.constant dense<0.000000e+00> : vector<16x32xf32>
    %29 = tpu.matmul %25, %1, %cst_31 {dimension_numbers = #tpu.dot_dimension_numbers<[1], [0], [0], [1], [0, 0, 1, 1], [], []>} : vector<16x32xbf16>, vector<32x32xbf16>, vector<16x32xf32> -> vector<16x32xf32>
    %30 = vector.broadcast %12 : vector<1x32xf32> to vector<16x32xf32>
    %31 = arith.addf %29, %30 : vector<16x32xf32>
    %cst_32 = arith.constant dense<0.000000e+00> : vector<16x32xf32>
    %32 = tpu.matmul %25, %2, %cst_32 {dimension_numbers = #tpu.dot_dimension_numbers<[1], [0], [0], [1], [0, 0, 1, 1], [], []>} : vector<16x32xbf16>, vector<32x32xbf16>, vector<16x32xf32> -> vector<16x32xf32>
    %33 = vector.broadcast %13 : vector<1x32xf32> to vector<16x32xf32>
    %34 = arith.addf %32, %33 : vector<16x32xf32>
    %35 = tpu.transpose %31, [1, 0] : vector<16x32xf32> -> vector<32x16xf32>
    %36 = arith.truncf %35 : vector<32x16xf32> to vector<32x16xbf16>
    %cst_33 = arith.constant dense<0.000000e+00> : vector<32x128xf32>
    %37 = tpu.matmul %36, %8, %cst_33 {dimension_numbers = #tpu.dot_dimension_numbers<[1], [0], [0], [1], [0, 0, 1, 1], [], []>} : vector<32x16xbf16>, vector<16x128xbf16>, vector<32x128xf32> -> vector<32x128xf32>
    %38 = arith.truncf %37 : vector<32x128xf32> to vector<32x128xbf16>
    %39 = arith.mulf %38, %7 : vector<32x128xbf16>
    %40 = arith.truncf %28 : vector<16x32xf32> to vector<16x32xbf16>
    %cst_34 = arith.constant dense<0.000000e+00> : vector<16x128xf32>
    %41 = tpu.matmul %40, %39, %cst_34 {dimension_numbers = #tpu.dot_dimension_numbers<[1], [0], [0], [1], [0, 0, 1, 1], [], []>} : vector<16x32xbf16>, vector<32x128xbf16>, vector<16x128xf32> -> vector<16x128xf32>
    %42 = arith.extf %9 : vector<16x128xbf16> to vector<16x128xf32>
    %43 = arith.addf %41, %42 : vector<16x128xf32>
    %cst_35 = arith.constant dense<0xFF800000> : vector<16xf32>
    %44 = vector.multi_reduction <maximumf>, %43, %cst_35 [1] : vector<16x128xf32> to vector<16xf32>
    %45 = vector.shape_cast %44 : vector<16xf32> to vector<16x1xf32>
    %46 = vector.broadcast %45 : vector<16x1xf32> to vector<16x128xf32>
    %47 = arith.subf %43, %46 : vector<16x128xf32>
    %48 = math.exp %47 : vector<16x128xf32>
    %49 = arith.truncf %48 : vector<16x128xf32> to vector<16x128xbf16>
    %50 = tpu.concatenate %34, %34, %34, %34, %34, %34, %34, %34 in 0 : vector<16x32xf32>, vector<16x32xf32>, vector<16x32xf32>, vector<16x32xf32>, vector<16x32xf32>, vector<16x32xf32>, vector<16x32xf32>, vector<16x32xf32> -> vector<128x32xf32>
    %51 = arith.truncf %50 : vector<128x32xf32> to vector<128x32xbf16>
    %52 = arith.mulf %51, %5 : vector<128x32xbf16>
    %cst_36 = arith.constant dense<0.000000e+00> : vector<16x32xf32>
    %53 = tpu.matmul %49, %52, %cst_36 {dimension_numbers = #tpu.dot_dimension_numbers<[1], [0], [0], [1], [0, 0, 1, 1], [], []>} : vector<16x128xbf16>, vector<128x32xbf16>, vector<16x32xf32> -> vector<16x32xf32>
    %cst_37 = arith.constant dense<0.000000e+00> : vector<16x32xf32>
    %54 = tpu.matmul %49, %5, %cst_37 {dimension_numbers = #tpu.dot_dimension_numbers<[1], [0], [0], [1], [0, 0, 1, 1], [], []>} : vector<16x128xbf16>, vector<128x32xbf16>, vector<16x32xf32> -> vector<16x32xf32>
    %55 = tpu.reciprocal %54 {approx = true} : vector<16x32xf32> -> vector<16x32xf32>
    %56 = arith.mulf %53, %55 : vector<16x32xf32>
    %57 = arith.truncf %56 : vector<16x32xf32> to vector<16x32xbf16>
    %cst_38 = arith.constant dense<0.000000e+00> : vector<16x32xf32>
    %58 = tpu.matmul %57, %3, %cst_38 {dimension_numbers = #tpu.dot_dimension_numbers<[1], [0], [0], [1], [0, 0, 1, 1], [], []>} : vector<16x32xbf16>, vector<32x32xbf16>, vector<16x32xf32> -> vector<16x32xf32>
    %59 = vector.broadcast %14 : vector<1x32xf32> to vector<16x32xf32>
    %60 = arith.addf %58, %59 : vector<16x32xf32>
    %61 = arith.addf %21, %60 : vector<16x32xf32>
    %cst_39 = arith.constant dense<0.000000e+00> : vector<16xf32>
    %62 = vector.multi_reduction <add>, %61, %cst_39 [1] : vector<16x32xf32> to vector<16xf32>
    %63 = vector.shape_cast %62 : vector<16xf32> to vector<16x1xf32>
    %cst_40 = arith.constant 3.200000e+01 : f32
    %64 = vector.broadcast %cst_40 : f32 to vector<16x1xf32>
    %65 = arith.divf %63, %64 : vector<16x1xf32>
    %66 = vector.broadcast %65 : vector<16x1xf32> to vector<16x32xf32>
    %67 = arith.subf %61, %66 : vector<16x32xf32>
    %68 = arith.mulf %67, %67 : vector<16x32xf32>
    %cst_41 = arith.constant dense<0.000000e+00> : vector<16xf32>
    %69 = vector.multi_reduction <add>, %68, %cst_41 [1] : vector<16x32xf32> to vector<16xf32>
    %70 = vector.shape_cast %69 : vector<16xf32> to vector<16x1xf32>
    %cst_42 = arith.constant 3.200000e+01 : f32
    %71 = vector.broadcast %cst_42 : f32 to vector<16x1xf32>
    %72 = arith.divf %70, %71 : vector<16x1xf32>
    %73 = vector.broadcast %65 : vector<16x1xf32> to vector<16x32xf32>
    %74 = arith.subf %61, %73 : vector<16x32xf32>
    %cst_43 = arith.constant 9.99999974E-6 : f32
    %75 = vector.broadcast %cst_43 : f32 to vector<16x1xf32>
    %76 = arith.addf %72, %75 : vector<16x1xf32>
    %77 = math.rsqrt %76 : vector<16x1xf32>
    %78 = vector.broadcast %77 : vector<16x1xf32> to vector<16x32xf32>
    %79 = arith.mulf %74, %78 : vector<16x32xf32>
    %80 = vector.broadcast %15 : vector<1x32xf32> to vector<16x32xf32>
    %81 = arith.mulf %79, %80 : vector<16x32xf32>
    %82 = vector.broadcast %16 : vector<1x32xf32> to vector<16x32xf32>
    %83 = arith.addf %81, %82 : vector<16x32xf32>
    %84 = arith.truncf %83 : vector<16x32xf32> to vector<16x32xbf16>
    %cst_44 = arith.constant dense<0.000000e+00> : vector<16x128xf32>
    %85 = tpu.matmul %84, %6, %cst_44 {dimension_numbers = #tpu.dot_dimension_numbers<[1], [0], [0], [1], [0, 0, 1, 1], [], []>} : vector<16x32xbf16>, vector<32x128xbf16>, vector<16x128xf32> -> vector<16x128xf32>
    %86 = arith.extf %10 : vector<1x128xbf16> to vector<1x128xf32>
    %87 = vector.broadcast %86 : vector<1x128xf32> to vector<16x128xf32>
    %88 = arith.addf %85, %87 : vector<16x128xf32>
    %cst_45 = arith.constant 0.000000e+00 : f32
    %89 = vector.broadcast %cst_45 : f32 to vector<16x128xf32>
    %90 = arith.maximumf %88, %89 : vector<16x128xf32>
    %91 = arith.truncf %90 : vector<16x128xf32> to vector<16x128xbf16>
    %cst_46 = arith.constant dense<0.000000e+00> : vector<16x32xf32>
    %92 = tpu.matmul %91, %4, %cst_46 {dimension_numbers = #tpu.dot_dimension_numbers<[1], [0], [0], [1], [0, 0, 1, 1], [], []>} : vector<16x128xbf16>, vector<128x32xbf16>, vector<16x32xf32> -> vector<16x32xf32>
    %93 = vector.broadcast %19 : vector<1x32xf32> to vector<16x32xf32>
    %94 = arith.addf %92, %93 : vector<16x32xf32>
    %95 = arith.addf %83, %94 : vector<16x32xf32>
    %cst_47 = arith.constant dense<0.000000e+00> : vector<16xf32>
    %96 = vector.multi_reduction <add>, %95, %cst_47 [1] : vector<16x32xf32> to vector<16xf32>
    %97 = vector.shape_cast %96 : vector<16xf32> to vector<16x1xf32>
    %cst_48 = arith.constant 3.200000e+01 : f32
    %98 = vector.broadcast %cst_48 : f32 to vector<16x1xf32>
    %99 = arith.divf %97, %98 : vector<16x1xf32>
    %100 = vector.broadcast %99 : vector<16x1xf32> to vector<16x32xf32>
    %101 = arith.subf %95, %100 : vector<16x32xf32>
    %102 = arith.mulf %101, %101 : vector<16x32xf32>
    %cst_49 = arith.constant dense<0.000000e+00> : vector<16xf32>
    %103 = vector.multi_reduction <add>, %102, %cst_49 [1] : vector<16x32xf32> to vector<16xf32>
    %104 = vector.shape_cast %103 : vector<16xf32> to vector<16x1xf32>
    %cst_50 = arith.constant 3.200000e+01 : f32
    %105 = vector.broadcast %cst_50 : f32 to vector<16x1xf32>
    %106 = arith.divf %104, %105 : vector<16x1xf32>
    %107 = vector.broadcast %99 : vector<16x1xf32> to vector<16x32xf32>
    %108 = arith.subf %95, %107 : vector<16x32xf32>
    %cst_51 = arith.constant 9.99999974E-6 : f32
    %109 = vector.broadcast %cst_51 : f32 to vector<16x1xf32>
    %110 = arith.addf %106, %109 : vector<16x1xf32>
    %111 = math.rsqrt %110 : vector<16x1xf32>
    %112 = vector.broadcast %111 : vector<16x1xf32> to vector<16x32xf32>
    %113 = arith.mulf %108, %112 : vector<16x32xf32>
    %114 = vector.broadcast %17 : vector<1x32xf32> to vector<16x32xf32>
    %115 = arith.mulf %113, %114 : vector<16x32xf32>
    %116 = vector.broadcast %18 : vector<1x32xf32> to vector<16x32xf32>
    %117 = arith.addf %115, %116 : vector<16x32xf32>
    %118 = vector.shape_cast %117 : vector<16x32xf32> to vector<2x8x32xf32>
    %c0_52 = arith.constant 0 : index
    %c0_53 = arith.constant 0 : index
    %c0_54 = arith.constant 0 : index
    %119 = vector.load %arg5[%c0_52, %c0_53, %c0_54] : memref<2x8x32xf32, #tpu.memory_space<vmem>>, vector<2x8x32xf32>
    tpu.vector_store %arg5[%c0_52, %c0_53, %c0_54], %118 {strides = array<i32>} : memref<2x8x32xf32, #tpu.memory_space<vmem>>, vector<2x8x32xf32>,
    return
  }
}

</mosaic_0001>

<bundles_post_ra>
// kernel: tile.0
= control target key start
LH: loop header
LB: loop body
LE: loop exit
PB: predicated region body
PF: predicated region fallthrough
CT: control target
= control target key end

     0   :  { %vm260_vm0 = vcmask 1047556   ;;  %vm262_vm1 = vcmask 130048   ;;  %s554_s22 = smov 80   ;;  %s555_s23 = smov 96   ;;  %vm281_vm2 = vcmask 1048448   ;;  %vm323_vm3 = vcmask 786048   ;;  %s615_s0 = inlined_call_operand.vmem [shape: bf16[16,8,16], index: 0, kind: input, shape index: {}]   ;;  %s616_s1 = inlined_call_operand.vmem [shape: bf16[16,128], index: 1, kind: output, shape index: {}]  }
   0x1   :  { %v504_v0 = vld [vmem:[%s615_s0 + $0x38] sm:$0xff]   ;;  %v505_v1 = vld [vmem:[%s615_s0 + $0x30] sm:$0xff]   ;;  %v506_v2 = vld [vmem:[%s615_s0 + $0x28] sm:$0xff]   ;;  %s556_s24 = smov 64   ;;  %s557_s25 = smov 48   ;;  %vm302_vm4 = vcmask 917248  }
   0x2   :  { %v469_v3 = vunpack.c.l.bf16 %v504_v0  ;;  %v470_v4 = vunpack.c.h.bf16 %v504_v0  ;;  %v473_v5 = vunpack.c.l.bf16 %v505_v1  ;;  %v474_v6 = vunpack.c.h.bf16 %v505_v1  ;;  %v507_v7 = vld [vmem:[%s615_s0 + $0x20] sm:$0xff]   ;;  %v508_v8 = vld [vmem:[%s615_s0 + $0x18] sm:$0xff]   ;;  %v509_v9 = vld [vmem:[%s615_s0 + $0x10] sm:$0xff]   ;;  %s558_s26 = smov 32   ;;  %s559_s27 = smov 16  }
   0x3   :  { %v477_v10 = vunpack.c.l.bf16 %v506_v2  ;;  %v478_v11 = vunpack.c.h.bf16 %v506_v2  ;;  %v481_v12 = vunpack.c.l.bf16 %v507_v7  ;;  %v482_v13 = vunpack.c.h.bf16 %v507_v7  ;;  %v510_v14 = vld [vmem:[%s615_s0 + $0x8] sm:$0xff]   ;;  %v496_v15 = vld [vmem:[%s615_s0] sm:$0xff]   ;;  %s553_s0 = smov 112  }
   0x4   :  { %21 = vst [vmem:[#allocation1 + $0x78] sm:$0xff] %v470_v4  ;;  %37 = vst [vmem:[#allocation1 + $0x70] sm:$0xff] %v469_v3  ;;  %v485_v16 = vunpack.c.l.bf16 %v508_v8  ;;  %v486_v17 = vunpack.c.h.bf16 %v508_v8  ;;  %v489_v18 = vunpack.c.l.bf16 %v509_v9  ;;  %v490_v19 = vunpack.c.h.bf16 %v509_v9 }
   0x5   :  { %53 = vst [vmem:[#allocation1 + $0x68] sm:$0xff] %v474_v6  ;;  %69 = vst [vmem:[#allocation1 + $0x60] sm:$0xff] %v473_v5  ;;  %v493_v20 = vunpack.c.l.bf16 %v510_v14  ;;  %v494_v21 = vunpack.c.h.bf16 %v510_v14  ;;  %v497_v22 = vunpack.c.l.bf16 %v496_v15  ;;  %v498_v23 = vunpack.c.h.bf16 %v496_v15 }
   0x6   :  { %85 = vst [vmem:[#allocation1 + $0x58] sm:$0xff] %v478_v11  ;;  %101 = vst [vmem:[#allocation1 + $0x50] sm:$0xff] %v477_v10  ;;  %vm344_vm5 = vcmask 654848   ;;  %vm365_vm6 = vcmask 523648   ;;  %vm386_vm7 = vcmask 392448   ;;  %vm407_vm8 = vcmask 261248  }
   0x7   :  { %117 = vst [vmem:[#allocation1 + $0x48] sm:$0xff] %v482_v13  ;;  %133 = vst [vmem:[#allocation1 + $0x40] sm:$0xff] %v481_v12 }
   0x8   :  { %149 = vst [vmem:[#allocation1 + $0x38] sm:$0xff] %v486_v17  ;;  %165 = vst [vmem:[#allocation1 + $0x30] sm:$0xff] %v485_v16 }
   0x9   :  { %181 = vst [vmem:[#allocation1 + $0x28] sm:$0xff] %v490_v19  ;;  %197 = vst [vmem:[#allocation1 + $0x20] sm:$0xff] %v489_v18 }
   0xa   :  { %213 = vst [vmem:[#allocation1 + $0x18] sm:$0xff] %v494_v21  ;;  %229 = vst [vmem:[#allocation1 + $0x10] sm:$0xff] %v493_v20 }
   0xb   :  { %244 = vst [vmem:[#allocation1 + $0x8] sm:$0xff] %v498_v23  ;;  %257 = vst [vmem:[#allocation1] sm:$0xff] %v497_v22 }
   0xc   :  { %v286_v24 = vld [vmem:[#allocation1 + $0x47] ss:$8 sm:$0xf0]   ;;  %v328_v25 = vld [vmem:[#allocation1 + $0x45] ss:$8 sm:$0xf0]  }
   0xd   :  { %v307_v42 = vld [vmem:[#allocation1 + $0x46] ss:$8 sm:$0xf0]   ;;  %v349_v49 = vld [vmem:[#allocation1 + $0x44] ss:$8 sm:$0xf0]  }
   0xe   :  { %v284_v26 = vld [vmem:[#allocation1 + $0x47] ss:$8 sm:$0xf]   ;;  %v326_v27 = vld [vmem:[#allocation1 + $0x45] ss:$8 sm:$0xf]  }
   0xf   :  { %v288_v29 = vsel %vm260_vm0, %v286_v24, %v284_v26  ;;  %v330_v31 = vsel %vm260_vm0, %v328_v25, %v326_v27  ;;  %v305_v41 = vld [vmem:[#allocation1 + $0x46] ss:$8 sm:$0xf]   ;;  %v347_v48 = vld [vmem:[#allocation1 + $0x44] ss:$8 sm:$0xf]  }
  0x10   :  { %v276_v28 = vld [vmem:[#allocation1 + $0x7] ss:$8 sm:$0xf0]   ;;  %v318_v30 = vld [vmem:[#allocation1 + $0x5] ss:$8 sm:$0xf0]   ;;  %v309_v43 = vsel %vm260_vm0, %v307_v42, %v305_v41  ;;  %v351_v50 = vsel %vm260_vm0, %v349_v49, %v347_v48 }
  0x11   :  { %v297_v37 = vld [vmem:[#allocation1 + $0x6] ss:$8 sm:$0xf0]   ;;  %v339_v45 = vld [vmem:[#allocation1 + $0x4] ss:$8 sm:$0xf0]  }
  0x12   :  { %v274_v32 = vld [vmem:[#allocation1 + $0x7] ss:$8 sm:$0xf]   ;;  %v316_v33 = vld [vmem:[#allocation1 + $0x5] ss:$8 sm:$0xf]  }
  0x13   :  { %v278_v34 = vsel %vm260_vm0, %v276_v28, %v274_v32  ;;  %v320_v35 = vsel %vm260_vm0, %v318_v30, %v316_v33  ;;  %v295_v36 = vld [vmem:[#allocation1 + $0x6] ss:$8 sm:$0xf]   ;;  %v337_v44 = vld [vmem:[#allocation1 + $0x4] ss:$8 sm:$0xf]  }
  0x14   :  { %v518_v38 = vpack.i.bf16 %v288_v29, %v278_v34  ;;  %v528_v39 = vpack.i.bf16 %v330_v31, %v320_v35  ;;  %v299_v40 = vsel %vm260_vm0, %v297_v37, %v295_v36  ;;  %v341_v47 = vsel %vm260_vm0, %v339_v45, %v337_v44  ;;  %v358_v51 = vld [vmem:[#allocation1 + $0x3] ss:$8 sm:$0xf]   ;;  %v379_v58 = vld [vmem:[#allocation1 + $0x2] ss:$8 sm:$0xf]  }
  0x15   :  { %v523_v46 = vpack.i.bf16 %v309_v43, %v299_v40  ;;  %v360_v52 = vld [vmem:[#allocation1 + $0x3] ss:$8 sm:$0xf0]   ;;  %v533_v53 = vpack.i.bf16 %v351_v50, %v341_v47  ;;  %v381_v59 = vld [vmem:[#allocation1 + $0x2] ss:$8 sm:$0xf0]  }
  0x16   :  { %519 = vrot.lane.b32.xlu0 %v518_v38, %s553_s0  ;;  %529 = vrot.lane.b32.xlu1 %v528_v39, %s554_s22  ;;  %v362_v54 = vsel %vm260_vm0, %v360_v52, %v358_v51  ;;  %v368_v55 = vld [vmem:[#allocation1 + $0x43] ss:$8 sm:$0xf]   ;;  %v383_v61 = vsel %vm260_vm0, %v381_v59, %v379_v58  ;;  %v389_v62 = vld [vmem:[#allocation1 + $0x42] ss:$8 sm:$0xf]  }
  0x17   :  { %v370_v56 = vld [vmem:[#allocation1 + $0x43] ss:$8 sm:$0xf0]   ;;  %v391_v63 = vld [vmem:[#allocation1 + $0x42] ss:$8 sm:$0xf0]  }
  0x18   :  { %v372_v57 = vsel %vm260_vm0, %v370_v56, %v368_v55  ;;  %v393_v0 = vsel %vm260_vm0, %v391_v63, %v389_v62  ;;  %v400_v1 = vld [vmem:[#allocation1 + $0x1] ss:$8 sm:$0xf]   ;;  %v258_v8 = vld [vmem:[#allocation1] ss:$8 sm:$0xf]  }
  0x19   :  { %v538_v60 = vpack.i.bf16 %v372_v57, %v362_v54  ;;  %v402_v2 = vld [vmem:[#allocation1 + $0x1] ss:$8 sm:$0xf0]   ;;  %v543_v3 = vpack.i.bf16 %v393_v0, %v383_v61  ;;  %v259_v9 = vld [vmem:[#allocation1] ss:$8 sm:$0xf0]  }
  0x1a   :  { %524 = vrot.lane.b32.xlu0 %v523_v46, %s555_s23  ;;  %534 = vrot.lane.b32.xlu1 %v533_v53, %s556_s24  ;;  %v404_v4 = vsel %vm260_vm0, %v402_v2, %v400_v1  ;;  %v410_v5 = vld [vmem:[#allocation1 + $0x41] ss:$8 sm:$0xf]   ;;  %v261_v11 = vsel %vm260_vm0, %v259_v9, %v258_v8  ;;  %v265_v12 = vld [vmem:[#allocation1 + $0x40] ss:$8 sm:$0xf]  }
  0x1b   :  { %v412_v6 = vld [vmem:[#allocation1 + $0x41] ss:$8 sm:$0xf0]   ;;  %v267_v13 = vld [vmem:[#allocation1 + $0x40] ss:$8 sm:$0xf0]  }
  0x1c   :  { %v414_v7 = vsel %vm260_vm0, %v412_v6, %v410_v5  ;;  %263 = vst.msk [vmem:[#allocation0] sm:$0xff] %vm262_vm1, %v261_v11   ;;  %v269_v14 = vsel %vm260_vm0, %v267_v13, %v265_v12 }
  0x1d   :  { %v548_v10 = vpack.i.bf16 %v414_v7, %v404_v4  ;;  %272 = vst.msk [vmem:[#allocation0 + $0x8] sm:$0xff] %vm262_vm1, %v269_v14  }
  0x1e   :  { %539 = vrot.lane.b32.xlu0 %v538_v60, %s557_s25  ;;  %544 = vrot.lane.b32.xlu1 %v543_v3, %s558_s26 }
  0x22   :  { %549 = vrot.lane.b32.xlu0 %v548_v10, %s559_s27 }
  0x88   :  { %v520_v15 = vpop.permute.xlu0 %519  ;;  %v530_v16 = vpop.permute.xlu1 %529 }
  0x89   :  { %v522_v17 = vunpack.i.h.bf16 %v520_v15  ;;  %v521_v18 = vunpack.i.l.bf16 %v520_v15  ;;  %v532_v25 = vunpack.i.h.bf16 %v530_v16  ;;  %v531_v26 = vunpack.i.l.bf16 %v530_v16 }
  0x8b   :  { %282 = vst.msk [vmem:[#allocation0] sm:$0xff] %vm281_vm2, %v521_v18   ;;  %293 = vst.msk [vmem:[#allocation0 + $0x8] sm:$0xff] %vm281_vm2, %v522_v17  }
  0x8c   :  { %v525_v19 = vpop.permute.xlu0 %524  ;;  %v535_v20 = vpop.permute.xlu1 %534 }
  0x8d   :  { %v527_v21 = vunpack.i.h.bf16 %v525_v19  ;;  %v526_v22 = vunpack.i.l.bf16 %v525_v19  ;;  %v537_v23 = vunpack.i.h.bf16 %v535_v20  ;;  %v536_v24 = vunpack.i.l.bf16 %v535_v20 }
  0x8f   :  { %303 = vst.msk [vmem:[#allocation0] sm:$0xff] %vm302_vm4, %v526_v22   ;;  %314 = vst.msk [vmem:[#allocation0 + $0x8] sm:$0xff] %vm302_vm4, %v527_v21  }
  0x90   :  { %324 = vst.msk [vmem:[#allocation0] sm:$0xff] %vm323_vm3, %v531_v26   ;;  %335 = vst.msk [vmem:[#allocation0 + $0x8] sm:$0xff] %vm323_vm3, %v532_v25   ;;  %v540_v27 = vpop.permute.xlu0 %539  ;;  %v545_v28 = vpop.permute.xlu1 %544 }
  0x91   :  { %345 = vst.msk [vmem:[#allocation0] sm:$0xff] %vm344_vm5, %v536_v24   ;;  %356 = vst.msk [vmem:[#allocation0 + $0x8] sm:$0xff] %vm344_vm5, %v537_v23   ;;  %v542_v29 = vunpack.i.h.bf16 %v540_v27  ;;  %v541_v30 = vunpack.i.l.bf16 %v540_v27  ;;  %v547_v31 = vunpack.i.h.bf16 %v545_v28  ;;  %v546_v32 = vunpack.i.l.bf16 %v545_v28 }
  0x93   :  { %366 = vst.msk [vmem:[#allocation0] sm:$0xff] %vm365_vm6, %v541_v30   ;;  %377 = vst.msk [vmem:[#allocation0 + $0x8] sm:$0xff] %vm365_vm6, %v542_v29  }
  0x94   :  { %387 = vst.msk [vmem:[#allocation0] sm:$0xff] %vm386_vm7, %v546_v32   ;;  %398 = vst.msk [vmem:[#allocation0 + $0x8] sm:$0xff] %vm386_vm7, %v547_v31   ;;  %v550_v33 = vpop.permute.xlu0 %549 }
  0x95   :  { %v552_v34 = vunpack.i.h.bf16 %v550_v33  ;;  %v551_v35 = vunpack.i.l.bf16 %v550_v33 }
  0x97   :  { %408 = vst.msk [vmem:[#allocation0] sm:$0xff] %vm407_vm8, %v551_v35   ;;  %419 = vst.msk [vmem:[#allocation0 + $0x8] sm:$0xff] %vm407_vm8, %v552_v34  }
  0x9e   :  { %v425_v36 = vld [vmem:[#allocation0] sm:$0xff]  ;;  %v431_v37 = vld [vmem:[#allocation0 + $0x8] sm:$0xff] }
  0x9f   :  { %v502_v38 = vpack.c.bf16 %v431_v37, %v425_v36 }
  0xa1   :  { %503 = vst [vmem:[%s616_s1] sm:$0xff] %v502_v38  }

// kernel: cross_attention_block.1
= control target key start
LH: loop header
LB: loop body
LE: loop exit
PB: predicated region body
PF: predicated region fallthrough
CT: control target
= control target key end

     0   :  { %v1192_v1 = vmov 0.0   ;;  %vm1193_vm0 = vmmov 0   ;;  %vm114_vm1 = vcmask 261120   ;;  %s1449_s0 = inlined_call_operand.vmem [shape: f32[2,8,32], index: 0, kind: input, shape index: {}]   ;;  %s1450_s1 = inlined_call_operand.vmem [shape: f32[2,8,32], index: 1, kind: input, shape index: {}]   ;;  %s1451_s2 = inlined_call_operand.vmem [shape: bf16[384,32], index: 2, kind: input, shape index: {}]   ;;  %s1452_s3 = inlined_call_operand.vmem [shape: bf16[104,128], index: 3, kind: input, shape index: {}]   ;;  %s1453_s4 = inlined_call_operand.vmem [shape: f32[16,32], index: 4, kind: input, shape index: {}]   ;;  %s1454_s5 = inlined_call_operand.hbm [shape: f32[2,8,32], index: 5, kind: output, shape index: {}]  }
   0x1   :  { %v1125_v0 = vld [vmem:[%s1451_s2 + $0x8] sm:$0xff]   ;;  %1006 = vmatprep.subr.bf16.mxu0 %v1192_v1  ;;  %v1126_v2 = vld [vmem:[%s1451_s2] sm:$0xff]   ;;  %1010 = vmatprep.mubr.msk.bf16.mxu0 %vm1193_vm0, %v1192_v1  ;;  %v1127_v6 = vld [vmem:[%s1451_s2 + $0x18] sm:$0xff]  }
   0x2   :  { %1007 = vmatpush3.bf16.msra.mxu0 %v1125_v0  ;;  %v1239_v3 = vld [vmem:[%s1449_s0] sm:$0xff]  ;;  %v1244_v4 = vld [vmem:[%s1449_s0 + $0x8] sm:$0xff]  ;;  %v1128_v7 = vld [vmem:[%s1451_s2 + $0x10] sm:$0xff]  }
   0x3   :  { %1008 = vmatprep.subr.bf16.mxu0 %v1192_v1  ;;  %v96_v5 = vpack.c.bf16 %v1244_v4, %v1239_v3  ;;  %v94_v8 = vld [vmem:[%s1450_s1] sm:$0xff]  ;;  %v95_v9 = vld [vmem:[%s1450_s1 + $0x8] sm:$0xff] }
   0x4   :  { %v97_v10 = vpack.c.bf16 %v95_v9, %v94_v8 }
   0x6   :  { %1009 = vmatpush3.bf16.msra.mxu0 %v1126_v2 }
   0x7   :  { %1014 = vmatprep.subr.bf16.mxu0 %v1192_v1 }
   0x9   :  { %1011 = vmatmul.mubr.msk.bf16.vlgmr.msra.gmra.mxu0 %vm114_vm1, %v96_v5 }
   0xa   :  { %1015 = vmatpush3.bf16.msra.mxu0 %v1127_v6  ;;  %1018 = vmatprep.mubr.msk.bf16.mxu0 %vm1193_vm0, %v1192_v1 }
   0xb   :  { %1016 = vmatprep.subr.bf16.mxu0 %v1192_v1 }
   0xe   :  { %1017 = vmatpush3.bf16.msra.mxu0 %v1128_v7 }
   0xf   :  { %1022 = vmatprep.subr.bf16.mxu0 %v1192_v1 }
  0x11   :  { %1019 = vmatmul.mubr.msk.bf16.vlgmr.msra.gmra.mxu0 %vm114_vm1, %v97_v10 }
  0x12   :  { %1026 = vmatprep.mubr.msk.bf16.mxu0 %vm1193_vm0, %v1192_v1 }
  0x13   :  { %10 = vsyncpa [#allocation3], 0  ;;  %v907_v12 = vld [vmem:[%s1453_s4] ss:$0 sm:$0xff]  ;;  %v911_v18 = vld [vmem:[%s1453_s4 + $0x1] ss:$0 sm:$0xff] }
  0x14   :  { %v1129_v26 = vld [vmem:[%s1452_s3 + $0x20] sm:$0xff]   ;;  %v1130_v27 = vld [vmem:[%s1451_s2 + $0x28] sm:$0xff]   ;;  %vm316_vm2 = vcmask 130048   ;;  %v1134_v41 = vld [vmem:[%s1451_s2 + $0xb8] sm:$0xff]   ;;  %s1194_s23 = smov [#allocation2]  }
  0x15   :  { %1030 = vmatprep.subr.bf16.mxu1 %v1129_v26  ;;  %1023 = vmatpush3.bf16.msra.mxu0 %v1130_v27  ;;  %v1131_v28 = vld [vmem:[%s1451_s2 + $0x20] sm:$0xff]   ;;  %v1135_v44 = vld [vmem:[%s1451_s2 + $0xb0] sm:$0xff]   ;;  %v1136_v47 = vld [vmem:[%s1451_s2 + $0xa8] sm:$0xff]   ;;  %s896_s24 = sshll.u32 %s1194_s23, 4  ;;  %s897_s24 = int_to_ptr.vmem [resolvable:$true] %s896_s24 }
  0x16   :  { %1031 = vmatpush3.bf16.msra.mxu1 %v1129_v26  ;;  %1024 = vmatprep.subr.bf16.mxu0 %v1192_v1  ;;  %v915_v35 = vld [vmem:[%s1453_s4 + $0x2] ss:$0 sm:$0xff]  ;;  %v1138_v51 = vld [vmem:[%s1451_s2 + $0x98] sm:$0xff]   ;;  %v1139_v53 = vld [vmem:[%s1451_s2 + $0x90] sm:$0xff]   ;;  %s1170_s25 = scalar_lea.vmem %s897_s24, 256  ;;  %p1175_p1 = scmp.lt.s32.totalorder %s897_s24, %s897_s24 }
  0x17   :  { %1044 = vmatprep.subr.bf16.mxu1 %v1192_v1  ;;  %v1137_v49 = vld [vmem:[%s1451_s2 + $0xa0] sm:$0xff]   ;;  %v1140_v55 = vld [vmem:[%s1451_s2 + $0x88] sm:$0xff]   ;;  %v1132_v59 = vld [vmem:[%s1452_s3 + $0x18] sm:$0xff]   ;;  %p1171_p0 = scmp.ne.s32.totalorder %s897_s24, %s1170_s25  ;;  %p1176_p2 = scmp.lt.s32.totalorder %s1170_s25, %s1170_s25 }
  0x18   :  { %v1133_v2 = vld [vmem:[%s1452_s3 + $0x10] sm:$0xff]   ;;  %v1141_v6 = vld [vmem:[%s1451_s2 + $0x80] sm:$0xff]   ;;  %v957_v8 = vld [vmem:[%s1452_s3 + $0x28] sm:$0xff]  }
  0x19   :  { %1025 = vmatpush3.bf16.msra.mxu0 %v1131_v28  ;;  %v955_v9 = vunpack.c.l.bf16 %v957_v8  ;;  %v1142_v26 = vld [vmem:[%s1451_s2 + $0x38] sm:$0xff]   ;;  %v1143_v27 = vld [vmem:[%s1451_s2 + $0x30] sm:$0xff]   ;;  %p1177_p3 = por %p1176_p2, %p1175_p1 }
  0x1a   :  { %1036 = vmatprep.subr.bf16.mxu0 %v1192_v1 }
  0x1b   :  { %p1178_p4 = pnand %p1177_p3, %p1171_p0 }
  0x1c   :  { %1027 = vmatmul.mubr.msk.bf16.vlgmr.msra.gmra.mxu0 %vm114_vm1, %v97_v10 }
  0x1d   :  { %1040 = vmatprep.mubr.msk.bf16.mxu0 %vm1193_vm0, %v1192_v1 }
  0xc9   :  { %v152_v11 = vpop.f32.mrf.mxu0 }
  0xca   :  { %v1273_v15 = vadd.f32 %v907_v12, %v152_v11 }
  0xcb   :  { %v1012_v13 = vpop.f32.mrf.mxu0 }
  0xcd   :  { %v155_v14 = vpop.f32.mrf.mxu0 }
  0xce   :  { %v1275_v16 = vadd.f32 %v907_v12, %v155_v14  ;;  %v956_v12 = vunpack.c.h.bf16 %v957_v8 }
  0xcf   :  { %v1013_v17 = vpop.f32.mrf.mxu0 }
  0xd0   :  { %v388_v19 = vpack.c.bf16 %v1275_v16, %v1273_v15 }
  0xd1   :  { %v212_v20 = vpop.f32.mrf.mxu0 }
  0xd2   :  { %v213_v21 = vadd.f32 %v911_v18, %v212_v20 }
  0xd3   :  { %v1020_v22 = vpop.f32.mrf.mxu0 }
  0xd4   :  { %276 = vxpose.xlu0.b32.start [1/2] (short) (narrow) %v213_v21, 32 }
  0xd5   :  { %v215_v23 = vpop.f32.mrf.mxu0 }
  0xd6   :  { %v216_v24 = vadd.f32 %v911_v18, %v215_v23 }
  0xd7   :  { %v1021_v25 = vpop.f32.mrf.mxu0 }
  0xd8   :  { %277 = vxpose.xlu0.b32.end [2/2] (short) (narrow) %v216_v24, 32 }
  0xdc   :  { %v269_v36 = vpop.f32.mrf.mxu0 }
  0xdd   :  { %v270_v38 = vadd.f32 %v915_v35, %v269_v36 }
  0xde   :  { %v1028_v37 = vpop.f32.mrf.mxu0 }
  0xe0   :  { %v272_v39 = vpop.f32.mrf.mxu0 }
  0xe1   :  { %v273_v40 = vadd.f32 %v915_v35, %v272_v39 }
  0xe2   :  { %v1029_v42 = vpop.f32.mrf.mxu0 }
  0xe3   :  { %v446_v43 = vpack.c.bf16 %v273_v40, %v270_v38 }
  0xe5   :  { %v502_v45 = vmul.bf16 %v1134_v41, %v446_v43  ;;  %v501_v46 = vmul.bf16 %v1135_v44, %v446_v43  ;;  %v500_v48 = vmul.bf16 %v1136_v47, %v446_v43  ;;  %v499_v50 = vmul.bf16 %v1137_v49, %v446_v43 }
  0xe6   :  { %v498_v52 = vmul.bf16 %v1138_v51, %v446_v43  ;;  %v497_v54 = vmul.bf16 %v1139_v53, %v446_v43  ;;  %v496_v56 = vmul.bf16 %v1140_v55, %v446_v43  ;;  %v495_v7 = vmul.bf16 %v1141_v6, %v446_v43 }
 0x150   :  { %v292_v29 = vpop.trf.xlu0 }
 0x154   :  { %v293_v30 = vpop.trf.xlu0 }
 0x155   :  { %v308_v31 = vpack.c.bf16 %v293_v30, %v292_v29 }
 0x157   :  { %1032 = vmatprep.mubr.msk.bf16.mxu1 %vm316_vm2, %v308_v31 }
 0x158   :  { %v294_v32 = vpop.trf.xlu0 }
 0x15c   :  { %v295_v33 = vpop.trf.xlu0 }
 0x15d   :  { %v309_v34 = vpack.c.bf16 %v295_v33, %v294_v32 }
 0x15f   :  { %1033 = vmatmul.mubr.msk.bf16.vlgmr.msra.gmra.mxu1 %vm316_vm2, %v309_v34 }
 0x160   :  { %1060 = vmatprep.mubr.msk.bf16.mxu1 %vm1193_vm0, %v1192_v1  ;;  %1045 = vmatpush3.bf16.msra.mxu1 %v502_v45 }
 0x161   :  { %1046 = vmatprep.subr.bf16.mxu1 %v1192_v1 }
 0x164   :  { %1047 = vmatpush3.bf16.msra.mxu1 %v501_v46 }
 0x165   :  { %1048 = vmatprep.subr.bf16.mxu1 %v1192_v1 }
 0x168   :  { %1049 = vmatpush3.bf16.msra.mxu1 %v500_v48 }
 0x169   :  { %1050 = vmatprep.subr.bf16.mxu1 %v1192_v1 }
 0x16c   :  { %1051 = vmatpush3.bf16.msra.mxu1 %v499_v50 }
 0x16d   :  { %1052 = vmatprep.subr.bf16.mxu1 %v1192_v1 }
 0x170   :  { %1053 = vmatpush3.bf16.msra.mxu1 %v498_v52 }
 0x171   :  { %1054 = vmatprep.subr.bf16.mxu1 %v1192_v1 }
 0x174   :  { %1055 = vmatpush3.bf16.msra.mxu1 %v497_v54 }
 0x175   :  { %1056 = vmatprep.subr.bf16.mxu1 %v1192_v1 }
 0x178   :  { %1057 = vmatpush3.bf16.msra.mxu1 %v496_v56 }
 0x179   :  { %1058 = vmatprep.subr.bf16.mxu1 %v1192_v1 }
 0x17c   :  { %1059 = vmatpush3.bf16.msra.mxu1 %v495_v7 }
 0x17d   :  { %1084 = vmatprep.subr.bf16.mxu1 %v1192_v1 }
 0x21f   :  { %v1034_v57 = vpop.f32.mrf.mxu1 }
 0x221   :  { %v357_v58 = vpop.f32.mrf.mxu1 }
 0x223   :  { %v1035_v60 = vpop.f32.mrf.mxu1 }
 0x224   :  { %v373_v61 = vpack.c.bf16 %v1035_v60, %v1034_v57 }
 0x225   :  { %v360_v62 = vpop.f32.mrf.mxu1 }
 0x226   :  { %v387_v63 = vmul.bf16 %v1132_v59, %v373_v61  ;;  %v372_v0 = vpack.c.bf16 %v360_v62, %v357_v58  ;;  %v1145_v61 = vld [vmem:[%s1452_s3] sm:$0xff]   ;;  %v1146_v62 = vld [vmem:[%s1451_s2 + $0x78] sm:$0xff]  }
 0x228   :  { %1037 = vmatpush3.bf16.msra.mxu0 %v387_v63  ;;  %v386_v5 = vmul.bf16 %v1133_v2, %v372_v0  ;;  %v1147_v63 = vld [vmem:[%s1451_s2 + $0x70] sm:$0xff]   ;;  %v1148_v0 = vld [vmem:[%s1451_s2 + $0x68] sm:$0xff]   ;;  %v1149_v2 = vld [vmem:[%s1451_s2 + $0x60] sm:$0xff]  }
 0x229   :  { %1038 = vmatprep.subr.bf16.mxu0 %v1192_v1 }
 0x22c   :  { %1039 = vmatpush3.bf16.msra.mxu0 %v386_v5  ;;  %v1150_v5 = vld [vmem:[%s1451_s2 + $0x58] sm:$0xff]  }
 0x22d   :  { %1064 = vmatprep.subr.bf16.mxu0 %v1192_v1 }
 0x22f   :  { %1041 = vmatmul.mubr.msk.bf16.vlgmr.msra.gmra.mxu0 %vm114_vm1, %v388_v19 }
 0x230   :  { %1065 = vmatpush3.bf16.msra.mxu0 %v1134_v41  ;;  %1080 = vmatprep.mubr.msk.bf16.mxu0 %vm1193_vm0, %v1192_v1  ;;  %v933_v41 = vld [vmem:[%s1453_s4 + $0x3] ss:$0 sm:$0xff] }
 0x231   :  { %1066 = vmatprep.subr.bf16.mxu0 %v1192_v1 }
 0x234   :  { %1067 = vmatpush3.bf16.msra.mxu0 %v1135_v44 }
 0x235   :  { %1068 = vmatprep.subr.bf16.mxu0 %v1192_v1 }
 0x238   :  { %1069 = vmatpush3.bf16.msra.mxu0 %v1136_v47 }
 0x239   :  { %1070 = vmatprep.subr.bf16.mxu0 %v1192_v1 }
 0x23c   :  { %1071 = vmatpush3.bf16.msra.mxu0 %v1137_v49 }
 0x23d   :  { %1072 = vmatprep.subr.bf16.mxu0 %v1192_v1 }
 0x240   :  { %1073 = vmatpush3.bf16.msra.mxu0 %v1138_v51 }
 0x241   :  { %1074 = vmatprep.subr.bf16.mxu0 %v1192_v1 }
 0x244   :  { %1075 = vmatpush3.bf16.msra.mxu0 %v1139_v53 }
 0x245   :  { %1076 = vmatprep.subr.bf16.mxu0 %v1192_v1 }
 0x248   :  { %1077 = vmatpush3.bf16.msra.mxu0 %v1140_v55 }
 0x249   :  { %1078 = vmatprep.subr.bf16.mxu0 %v1192_v1 }
 0x24c   :  { %1079 = vmatpush3.bf16.msra.mxu0 %v1141_v6 }
 0x24d   :  { %1092 = vmatprep.subr.bf16.mxu0 %v1192_v1 }
 0x2ef   :  { %v428_v10 = vpop.f32.mrf.mxu0 }
 0x2f0   :  { %v429_v11 = vadd.f32 %v955_v9, %v428_v10 }
 0x2f1   :  { %v1042_v13 = vpop.f32.mrf.mxu0 }
 0x2f2   :  { %435 = vmax.xlane.f32.xlu1 %v429_v11 }
 0x2f3   :  { %v431_v14 = vpop.f32.mrf.mxu0 }
 0x2f4   :  { %v432_v15 = vadd.f32 %v956_v12, %v431_v14  ;;  %v937_v14 = vld [vmem:[%s1453_s4 + $0x4] ss:$0 sm:$0xff] }
 0x2f5   :  { %v1043_v16 = vpop.f32.mrf.mxu0 }
 0x2f6   :  { %437 = vmax.xlane.f32.xlu1 %v432_v15 }
 0x37b   :  { %v436_v17 = vpop.xlane.xlu1 %435 }
 0x37c   :  { %v439_v18 = vsub.f32 %v429_v11, %v436_v17 }
 0x37e   :  { %v441_v19 = vmul.f32 1.442695, %v439_v18  ;;  %v938_v18 = vld [vmem:[%s1453_s4 + $0x5] ss:$0 sm:$0xff] }
 0x37f   :  { %v438_v20 = vpop.xlane.xlu1 %437 }
 0x380   :  { %v440_v21 = vsub.f32 %v432_v15, %v438_v20  ;;  %1154 = vpow2.f32 %v441_v19 }
 0x382   :  { %v443_v22 = vmul.f32 1.442695, %v440_v21 }
 0x384   :  { %1156 = vpow2.f32 %v443_v22 }
 0x38d   :  { %v1155_v23 = vpop.eup %1154 }
 0x391   :  { %v1157_v24 = vpop.eup %1156 }
 0x392   :  { %v445_v25 = vpack.c.bf16 %v1157_v24, %v1155_v23  ;;  %v1151_v23 = vld [vmem:[%s1451_s2 + $0x50] sm:$0xff]   ;;  %v1152_v24 = vld [vmem:[%s1451_s2 + $0x48] sm:$0xff]  }
 0x394   :  { %1061 = vmatmul.mubr.bf16.vlgmr.msra.gmra.mxu1 %v445_v25  ;;  %1081 = vmatmul.mubr.bf16.vlgmr.msra.gmra.mxu0 %v445_v25  ;;  %v1153_v25 = vld [vmem:[%s1451_s2 + $0x40] sm:$0xff]  }
 0x395   :  { %1088 = vmatprep.mubr.msk.bf16.mxu1 %vm1193_vm0, %v1192_v1  ;;  %1096 = vmatprep.mubr.msk.bf16.mxu0 %vm1193_vm0, %v1192_v1 }
 0x396   :  { %1085 = vmatpush3.bf16.msra.mxu1 %v1142_v26  ;;  %v693_v26 = vlaneseq }
 0x397   :  { %1086 = vmatprep.subr.bf16.mxu1 %v1192_v1 }
 0x39a   :  { %1087 = vmatpush3.bf16.msra.mxu1 %v1143_v27  ;;  %v694_v27 = vshrl.u32 %v693_v26, 7 }
 0x39b   :  { %1100 = vmatprep.subr.bf16.mxu1 %v1192_v1 }
 0x454   :  { %v537_v28 = vpop.f32.mrf.mxu1  ;;  %v578_v29 = vpop.f32.mrf.mxu0 }
 0x455   :  { %1158 = vrcp.f32 %v578_v29 }
 0x456   :  { %v1062_v30 = vpop.f32.mrf.mxu1  ;;  %v1082_v31 = vpop.f32.mrf.mxu0 }
 0x457   :  { %v695_v30 = vsub.s32 0, %v694_v27 }
 0x458   :  { %v540_v32 = vpop.f32.mrf.mxu1  ;;  %v581_v33 = vpop.f32.mrf.mxu0 }
 0x459   :  { %1160 = vrcp.f32 %v581_v33 }
 0x45a   :  { %v1063_v34 = vpop.f32.mrf.mxu1  ;;  %v1083_v35 = vpop.f32.mrf.mxu0 }
 0x462   :  { %v1159_v36 = vpop.eup %1158 }
 0x463   :  { %v587_v38 = vmul.f32 %v1159_v36, %v537_v28  ;;  %v82_v28 = vld [vmem:[%s1452_s3 + $0x30] sm:$0x1] }
 0x464   :  { %v692_v29 = vunpack.c.l.bf16 %v82_v28 }
 0x466   :  { %v1161_v37 = vpop.eup %1160  ;;  %v696_v31 = vrot.slane %v692_v29, %v695_v30 }
 0x467   :  { %v588_v39 = vmul.f32 %v1161_v37, %v540_v32 }
 0x469   :  { %v589_v40 = vpack.c.bf16 %v588_v39, %v587_v38 }
 0x46b   :  { %1089 = vmatmul.mubr.msk.bf16.vlgmr.msra.gmra.mxu1 %vm114_vm1, %v589_v40  ;;  %v942_v40 = vld [vmem:[%s1453_s4 + $0x8] ss:$0 sm:$0xff] }
 0x46c   :  { %1116 = vmatprep.mubr.msk.bf16.mxu1 %vm1193_vm0, %v1192_v1  ;;  %1101 = vmatpush3.bf16.msra.mxu1 %v1146_v62 }
 0x46d   :  { %1102 = vmatprep.subr.bf16.mxu1 %v1192_v1 }
 0x470   :  { %1103 = vmatpush3.bf16.msra.mxu1 %v1147_v63 }
 0x471   :  { %1104 = vmatprep.subr.bf16.mxu1 %v1192_v1 }
 0x474   :  { %1105 = vmatpush3.bf16.msra.mxu1 %v1148_v0 }
 0x475   :  { %1106 = vmatprep.subr.bf16.mxu1 %v1192_v1 }
 0x478   :  { %1107 = vmatpush3.bf16.msra.mxu1 %v1149_v2 }
 0x479   :  { %1108 = vmatprep.subr.bf16.mxu1 %v1192_v1 }
 0x47c   :  { %1109 = vmatpush3.bf16.msra.mxu1 %v1150_v5  ;;  %v951_v5 = vld [vmem:[%s1453_s4 + $0x6] ss:$0 sm:$0xff] }
 0x47d   :  { %1110 = vmatprep.subr.bf16.mxu1 %v1192_v1 }
 0x480   :  { %1111 = vmatpush3.bf16.msra.mxu1 %v1151_v23 }
 0x481   :  { %1112 = vmatprep.subr.bf16.mxu1 %v1192_v1 }
 0x484   :  { %1113 = vmatpush3.bf16.msra.mxu1 %v1152_v24 }
 0x485   :  { %1114 = vmatprep.subr.bf16.mxu1 %v1192_v1 }
 0x488   :  { %1115 = vmatpush3.bf16.msra.mxu1 %v1153_v25 }
 0x52b   :  { %v643_v42 = vpop.f32.mrf.mxu1 }
 0x52c   :  { %v644_v43 = vadd.f32 %v933_v41, %v643_v42 }
 0x52d   :  { %v1090_v44 = vpop.f32.mrf.mxu1 }
 0x52e   :  { %v650_v45 = vadd.f32 %v644_v43, %v1239_v3 }
 0x52f   :  { %v646_v46 = vpop.f32.mrf.mxu1 }
 0x530   :  { %v647_v47 = vadd.f32 %v933_v41, %v646_v46  ;;  %v652_v48 = vsel %vm114_vm1, %v650_v45, 0.0 }
 0x531   :  { %653 = vadd.xlane.f32.xlu0 %v652_v48  ;;  %v1091_v49 = vpop.f32.mrf.mxu1 }
 0x532   :  { %v651_v50 = vadd.f32 %v647_v47, %v1244_v4  ;;  %v1144_v4 = vld [vmem:[%s1452_s3 + $0x8] sm:$0xff]  }
 0x533   :  { %1093 = vmatpush3.bf16.msra.mxu0 %v1144_v4 }
 0x534   :  { %v655_v51 = vsel %vm114_vm1, %v651_v50, 0.0  ;;  %1094 = vmatprep.subr.bf16.mxu0 %v1192_v1 }
 0x535   :  { %656 = vadd.xlane.f32.xlu1 %v655_v51 }
 0x537   :  { %1095 = vmatpush3.bf16.msra.mxu0 %v1145_v61 }
 0x5ba   :  { %v654_v52 = vpop.xlane.xlu0 %653 }
 0x5bb   :  { %v659_v53 = vmul.f32 0.03125, %v654_v52 }
 0x5bd   :  { %v661_v54 = vsub.f32 %v650_v45, %v659_v53 }
 0x5be   :  { %v657_v55 = vpop.xlane.xlu1 %656 }
 0x5bf   :  { %v660_v56 = vmul.f32 0.03125, %v657_v55  ;;  %v663_v57 = vmul.f32 %v661_v54, %v661_v54 }
 0x5c1   :  { %v662_v58 = vsub.f32 %v651_v50, %v660_v56  ;;  %v665_v3 = vsel %vm114_vm1, %v663_v57, 0.0 }
 0x5c2   :  { %666 = vadd.xlane.f32.xlu1 %v665_v3 }
 0x5c3   :  { %v664_v59 = vmul.f32 %v662_v58, %v662_v58 }
 0x5c5   :  { %v668_v60 = vsel %vm114_vm1, %v664_v59, 0.0 }
 0x5c6   :  { %669 = vadd.xlane.f32.xlu1 %v668_v60 }
 0x64b   :  { %v667_v6 = vpop.xlane.xlu1 %666 }
 0x64c   :  { %v671_v7 = vmul.f32 0.03125, %v667_v6 }
 0x64e   :  { %v673_v8 = vadd.f32 1e-05, %v671_v7  ;;  %v952_v7 = vld [vmem:[%s1453_s4 + $0x7] ss:$0 sm:$0xff] }
 0x64f   :  { %v670_v9 = vpop.xlane.xlu1 %669 }
 0x650   :  { %1162 = vrsqrt.f32 %v673_v8  ;;  %v672_v10 = vmul.f32 0.03125, %v670_v9 }
 0x652   :  { %v674_v11 = vadd.f32 1e-05, %v672_v10 }
 0x654   :  { %1164 = vrsqrt.f32 %v674_v11 }
 0x65d   :  { %v1163_v12 = vpop.eup %1162 }
 0x65e   :  { %v677_v13 = vmul.f32 %v1163_v12, %v661_v54 }
 0x660   :  { %v683_v17 = vmul.f32 %v937_v14, %v677_v13 }
 0x661   :  { %v1165_v15 = vpop.eup %1164 }
 0x662   :  { %v678_v16 = vmul.f32 %v1165_v15, %v662_v58  ;;  %v689_v20 = vadd.f32 %v938_v18, %v683_v17 }
 0x664   :  { %v684_v19 = vmul.f32 %v937_v14, %v678_v16 }
 0x666   :  { %v690_v21 = vadd.f32 %v938_v18, %v684_v19 }
 0x668   :  { %v691_v22 = vpack.c.bf16 %v690_v21, %v689_v20 }
 0x66a   :  { %1097 = vmatmul.mubr.msk.bf16.vlgmr.msra.gmra.mxu0 %vm114_vm1, %v691_v22 }
 0x72a   :  { %v746_v32 = vpop.f32.mrf.mxu0 }
 0x72b   :  { %v747_v34 = vadd.f32 %v746_v32, %v696_v31 }
 0x72c   :  { %v1098_v33 = vpop.f32.mrf.mxu0 }
 0x72d   :  { %v753_v37 = vmax.f32 %v747_v34, 0.0 }
 0x72e   :  { %v749_v35 = vpop.f32.mrf.mxu0 }
 0x72f   :  { %v750_v36 = vadd.f32 %v749_v35, %v696_v31 }
 0x730   :  { %v1099_v1 = vpop.f32.mrf.mxu0 }
 0x731   :  { %v754_v38 = vmax.f32 %v750_v36, 0.0 }
 0x733   :  { %v755_v39 = vpack.c.bf16 %v754_v38, %v753_v37 }
 0x735   :  { %1117 = vmatmul.mubr.bf16.vlgmr.msra.gmra.mxu1 %v755_v39 }
 0x7f5   :  { %v842_v41 = vpop.f32.mrf.mxu1 }
 0x7f6   :  { %v843_v42 = vadd.f32 %v942_v40, %v842_v41 }
 0x7f7   :  { %v1118_v43 = vpop.f32.mrf.mxu1 }
 0x7f8   :  { %v849_v44 = vadd.f32 %v843_v42, %v689_v20 }
 0x7f9   :  { %v845_v45 = vpop.f32.mrf.mxu1 }
 0x7fa   :  { %v846_v46 = vadd.f32 %v942_v40, %v845_v45  ;;  %v851_v47 = vsel %vm114_vm1, %v849_v44, 0.0 }
 0x7fb   :  { %852 = vadd.xlane.f32.xlu1 %v851_v47  ;;  %v1119_v48 = vpop.f32.mrf.mxu1 }
 0x7fc   :  { %v850_v49 = vadd.f32 %v846_v46, %v690_v21 }
 0x7fe   :  { %v854_v50 = vsel %vm114_vm1, %v850_v49, 0.0 }
 0x7ff   :  { %855 = vadd.xlane.f32.xlu1 %v854_v50 }
 0x884   :  { %v853_v51 = vpop.xlane.xlu1 %852 }
 0x885   :  { %v857_v52 = vmul.f32 0.03125, %v853_v51 }
 0x887   :  { %v859_v53 = vsub.f32 %v849_v44, %v857_v52 }
 0x888   :  { %v856_v54 = vpop.xlane.xlu1 %855 }
 0x889   :  { %v858_v55 = vmul.f32 0.03125, %v856_v54  ;;  %v861_v56 = vmul.f32 %v859_v53, %v859_v53 }
 0x88b   :  { %v860_v57 = vsub.f32 %v850_v49, %v858_v55  ;;  %v863_v58 = vsel %vm114_vm1, %v861_v56, 0.0 }
 0x88c   :  { %864 = vadd.xlane.f32.xlu1 %v863_v58 }
 0x88d   :  { %v862_v3 = vmul.f32 %v860_v57, %v860_v57 }
 0x88f   :  { %v866_v59 = vsel %vm114_vm1, %v862_v3, 0.0 }
 0x890   :  { %867 = vadd.xlane.f32.xlu1 %v866_v59 }
 0x915   :  { %v865_v60 = vpop.xlane.xlu1 %864 }
 0x916   :  { %v869_v4 = vmul.f32 0.03125, %v865_v60 }
 0x918   :  { %v871_v61 = vadd.f32 1e-05, %v869_v4 }
 0x919   :  { %v868_v62 = vpop.xlane.xlu1 %867 }
 0x91a   :  { %1166 = vrsqrt.f32 %v871_v61  ;;  %v870_v63 = vmul.f32 0.03125, %v868_v62 }
 0x91c   :  { %v872_v0 = vadd.f32 1e-05, %v870_v63 }
 0x91e   :  { %1168 = vrsqrt.f32 %v872_v0 }
 0x927   :  { %v1167_v2 = vpop.eup %1166 }
 0x928   :  { %v875_v6 = vmul.f32 %v1167_v2, %v859_v53 }
 0x92a   :  { %v881_v8 = vmul.f32 %v951_v5, %v875_v6 }
 0x92b   :  { %v1169_v9 = vpop.eup %1168 }
 0x92c   :  { %v876_v10 = vmul.f32 %v1169_v9, %v860_v57  ;;  %v887_v11 = vadd.f32 %v952_v7, %v881_v8 }
 0x92e   :  { %v882_v12 = vmul.f32 %v951_v5, %v876_v10  ;;  %889 = vst.msk [vmem:[#allocation2] sm:$0xff] %vm114_vm1, %v887_v11 }
 0x930   :  { %v888_v13 = vadd.f32 %v952_v7, %v882_v12 }
 0x932   :  { %890 = vst.msk [vmem:[#allocation2 + $0x8] sm:$0xff] %vm114_vm1, %v888_v13 }
 0x933   :  { %1181 = shalt.err (!%p1178_p4)
}
 0x934   :  { %s1195_s4 = smov 128   ;;  %s1196_s26 = smov 8  }
 0x935   :  { %902 = dma.vmem_to_hbm [thread:$0]  %s897_s24, 256, %s1454_s5, [#allocation3], %s1195_s4, %s1195_s4, %s1196_s26  }
 0x936   :  { %1190 = dma.done.wait [#allocation3], 256  }
 0x937   :  { %1191 = vsyncadd [#allocation3], 4294967040 }
 0x938   :  { %906 = vsyncpa [#allocation3], 1 }

</bundles_post_ra>
